<compile_context>
chip_gen: v7x
topology: tpu7x:2x2x1
jax: 0.10.0
libtpu: 0.0.40
codegen_flags: <defaults>
</compile_context>

<pallas_src>
import math

import jax
import jax.numpy as jnp
from jax.experimental import pallas as pl
from jax.experimental.pallas import tpu as pltpu


# ---------------------------------------------------------------------------
# Parameter packing (hoisted out of the forward path; do this at model init)
# ---------------------------------------------------------------------------
def pack_qkv_params(q_w, q_b, k_w, k_b, v_w, v_b, num_heads):
    """q/k/v weights in torch nn.Linear layout [out, in].  Folds 1/sqrt(D)
    into the Q weight/bias and packs into ([H, 3H], [1, 3H])."""
    H = q_w.shape[0]
    D = H // num_heads
    scale = 1.0 / math.sqrt(D)
    w_qkv = jnp.concatenate([(q_w * scale).T, k_w.T, v_w.T], axis=1)      # [H, 3H]
    b_qkv = jnp.concatenate([q_b * scale, k_b, v_b]).reshape(1, 3 * H)    # [1, 3H]
    return w_qkv, b_qkv


# ---------------------------------------------------------------------------
# Kernel 1: fused QKV projection -> three lane-dense [M, H] outputs
# ---------------------------------------------------------------------------
def _qkv_proj_kernel(x_ref, w_ref, b_ref, q_ref, k_ref, v_ref):
    acc = jnp.dot(x_ref[...], w_ref[...], preferred_element_type=jnp.float32)
    acc = (acc + b_ref[...]).astype(q_ref.dtype)
    H = q_ref.shape[1]
    q_ref[...] = acc[:, :H]
    k_ref[...] = acc[:, H:2 * H]
    v_ref[...] = acc[:, 2 * H:]


def _qkv_projection(x, w_qkv, b_qkv, *, tm=256):
    M, H = x.shape
    N3 = w_qkv.shape[1]
    Ho = N3 // 3
    TM = min(tm, M)
    grid = (pl.cdiv(M, TM),)
    out_shape = tuple(jax.ShapeDtypeStruct((M, Ho), x.dtype) for _ in range(3))
    return pl.pallas_call(
        _qkv_proj_kernel,
        out_shape=out_shape,
        grid_spec=pltpu.PrefetchScalarGridSpec(
            num_scalar_prefetch=0,
            grid=grid,
            in_specs=[
                pl.BlockSpec((TM, H), lambda i: (i, 0)),
                pl.BlockSpec((H, N3), lambda i: (0, 0)),   # weight: constant block
                pl.BlockSpec((1, N3), lambda i: (0, 0)),   # bias row
            ],
            out_specs=tuple(pl.BlockSpec((TM, Ho), lambda i: (i, 0))
                            for _ in range(3)),
        ),
        compiler_params=pltpu.CompilerParams(
            dimension_semantics=("parallel",),
            vmem_limit_bytes=48 * 1024 * 1024),
    )(x, w_qkv, b_qkv)


# ---------------------------------------------------------------------------
# Kernel 2: attention (all heads per block) + softmax + context, lane-dense out
# ---------------------------------------------------------------------------
def _make_attention_kernel(nH, D, scale, has_rel, has_rel2d, has_mask):
    def kernel(*refs):
        i = 0
        q_ref = refs[i]; i += 1
        k_ref = refs[i]; i += 1
        v_ref = refs[i]; i += 1
        rel_ref = rel2d_ref = mask_ref = None
        if has_rel:
            rel_ref = refs[i]; i += 1
        if has_rel2d:
            rel2d_ref = refs[i]; i += 1
        if has_mask:
            mask_ref = refs[i]; i += 1
        o_ref = refs[i]

        q = q_ref[0]                               # [TQ, H]  (pre-scaled by 1/sqrt(D))
        k = k_ref[0]                               # [S,  H]
        v = v_ref[0]                               # [S,  H]
        mask = mask_ref[0] if has_mask else None   # [1,  S]  broadcasts over rows

        ctx_heads = []
        for h in range(nH):                        # static unroll over heads
            sl = slice(h * D, (h + 1) * D)
            qh, kh, vh = q[:, sl], k[:, sl], v[:, sl]
            # scores = q_h @ k_h^T, contracting over D without explicit transpose
            s = jax.lax.dot_general(qh, kh, (((1,), (1,)), ((), ())),
                                    preferred_element_type=jnp.float32)
            if has_rel and has_rel2d:
                s = s + (rel_ref[0, h] + rel2d_ref[0, h]).astype(jnp.float32) * scale
            elif has_rel:
                s = s + rel_ref[0, h].astype(jnp.float32) * scale
            # (lone rel_2d_pos is ignored, mirroring the PyTorch module's elif)
            if has_mask:
                s = s + mask
            # CogView / PB-Relax softmax == standard softmax.
            m = jnp.max(s, axis=-1, keepdims=True)
            p = jnp.exp(s - m)
            l = jnp.sum(p, axis=-1, keepdims=True)
            # TODO(synk): dropout / head_mask would multiply `p` here (eval: no-op).
            # NOTE: p is downcast to the activation dtype for the PV matmul when
            # activations are bf16 (slight deviation from f32-probs reference).
            ctx_h = jnp.dot(p.astype(vh.dtype), vh,
                            preferred_element_type=jnp.float32)
            ctx_h = ctx_h * pl.reciprocal(l, approx=True)   # deferred normalize
            ctx_heads.append(ctx_h)

        o_ref[0] = jnp.concatenate(ctx_heads, axis=-1).astype(o_ref.dtype)  # [TQ, H]
    return kernel


# ---------------------------------------------------------------------------
# Wrapper: full LayoutLMv3SelfAttention forward
# ---------------------------------------------------------------------------
def layoutlmv3_self_attention(hidden_states, w_qkv, b_qkv, num_attention_heads,
                              attention_mask=None, rel_pos=None, rel_2d_pos=None,
                              *, tq=128, tm=256):
    """hidden_states: [B, S, H].  (w_qkv, b_qkv) from pack_qkv_params.
    attention_mask: optional additive, broadcastable mask [B,1,1,S] / [B,1,S] /
    [B,S] (a full per-query [B,1,S,S] mask is NOT supported).
    rel_pos / rel_2d_pos: optional additive biases [B or 1, nH, S, S] (raw,
    unscaled — the 1/sqrt(D) scaling happens in-kernel).
    Returns context_layer [B, S, H]."""
    B, S, H = hidden_states.shape
    nH = num_attention_heads
    D = H // nH
    scale = 1.0 / math.sqrt(D)
    M = B * S
    dtype = hidden_states.dtype

    # ---- fused QKV projection (no wrapper-side transposes or slices) ----
    q, k, v = _qkv_projection(hidden_states.reshape(M, H), w_qkv, b_qkv, tm=tm)
    q = q.reshape(B, S, H)
    k = k.reshape(B, S, H)
    v = v.reshape(B, S, H)

    TQ = min(tq, S)

    in_specs = [
        pl.BlockSpec((1, TQ, H), lambda b, qt: (b, qt, 0)),   # Q tile (all heads)
        pl.BlockSpec((1, S, H), lambda b, qt: (b, 0, 0)),     # full K (all heads)
        pl.BlockSpec((1, S, H), lambda b, qt: (b, 0, 0)),     # full V (all heads)
    ]
    args = [q, k, v]

    has_rel = rel_pos is not None
    has_rel2d = has_rel and (rel_2d_pos is not None)
    # TODO(synk): a lone rel_2d_pos (without rel_pos) is silently ignored,
    #             mirroring the PyTorch module's elif chain.

    if has_rel:
        rb = rel_pos.shape[0]                                # 1 or B
        in_specs.append(pl.BlockSpec(
            (1, nH, TQ, S),
            (lambda b, qt: (b, 0, qt, 0)) if rb > 1
            else (lambda b, qt: (0, 0, qt, 0))))
        args.append(rel_pos)
    if has_rel2d:
        rb2 = rel_2d_pos.shape[0]
        in_specs.append(pl.BlockSpec(
            (1, nH, TQ, S),
            (lambda b, qt: (b, 0, qt, 0)) if rb2 > 1
            else (lambda b, qt: (0, 0, qt, 0))))
        args.append(rel_2d_pos)
    if attention_mask is not None:
        assert attention_mask.size == B * S, (
            "expected a broadcastable [B,1,1,S]-style additive mask")
        mask3 = attention_mask.reshape(B, 1, S)
        in_specs.append(pl.BlockSpec((1, 1, S), lambda b, qt: (b, 0, 0)))
        args.append(mask3)

    kernel = _make_attention_kernel(nH, D, scale, has_rel, has_rel2d,
                                    attention_mask is not None)

    grid = (B, pl.cdiv(S, TQ))
    out = pl.pallas_call(
        kernel,
        out_shape=jax.ShapeDtypeStruct((B, S, H), dtype),
        grid_spec=pltpu.PrefetchScalarGridSpec(
            num_scalar_prefetch=0,
            grid=grid,
            in_specs=in_specs,
            out_specs=pl.BlockSpec((1, TQ, H), lambda b, qt: (b, qt, 0)),
        ),
        compiler_params=pltpu.CompilerParams(
            dimension_semantics=("parallel", "parallel"),
            vmem_limit_bytes=48 * 1024 * 1024),
    )(*args)
    # Output is already [B, S, H] and lane-dense: no reshape/transpose needed.
    return out


# ---------------------------------------------------------------------------
# Pure-JAX reference mirroring the PyTorch module (eval mode, no dropout)
# ---------------------------------------------------------------------------
def _reference(hidden_states, q_w, q_b, k_w, k_b, v_w, v_b, num_heads,
               attention_mask=None, rel_pos=None, rel_2d_pos=None, alpha=32.0):
    B, S, H = hidden_states.shape
    D = H // num_heads

    def linear(x, w, b):
        return jnp.einsum('bsh,oh->bso', x, w) + b

    def heads(t):
        return t.reshape(B, S, num_heads, D).transpose(0, 2, 1, 3)

    q = heads(linear(hidden_states, q_w, q_b))
    k = heads(linear(hidden_states, k_w, k_b))
    v = heads(linear(hidden_states, v_w, v_b))
    scores = jnp.einsum('bhqd,bhkd->bhqk', q / math.sqrt(D), k)
    if rel_pos is not None and rel_2d_pos is not None:
        scores = scores + (rel_pos + rel_2d_pos) / math.sqrt(D)
    elif rel_pos is not None:
        scores = scores + rel_pos / math.sqrt(D)
    if attention_mask is not None:
        scores = scores + attention_mask
    scaled = scores / alpha
    m = jnp.max(scaled, axis=-1, keepdims=True)
    probs = jax.nn.softmax((scaled - m) * alpha, axis=-1)
    ctx = jnp.einsum('bhqk,bhkd->bhqd', probs, v)
    return ctx.transpose(0, 2, 1, 3).reshape(B, S, H)


if __name__ == "__main__":
    # Small, module-consistent shapes: batch=2, seq=8, hidden=32, heads=2.
    B, S, H, NH = 2, 8, 32, 2
    D = H // NH

    key = jax.random.PRNGKey(0)
    ks = jax.random.split(key, 10)
    hidden_states = jax.random.normal(ks[0], (B, S, H), dtype=jnp.float32)
    q_w = 0.02 * jax.random.normal(ks[1], (H, H), dtype=jnp.float32)
    q_b = 0.02 * jax.random.normal(ks[2], (H,), dtype=jnp.float32)
    k_w = 0.02 * jax.random.normal(ks[3], (H, H), dtype=jnp.float32)
    k_b = 0.02 * jax.random.normal(ks[4], (H,), dtype=jnp.float32)
    v_w = 0.02 * jax.random.normal(ks[5], (H, H), dtype=jnp.float32)
    v_b = 0.02 * jax.random.normal(ks[6], (H,), dtype=jnp.float32)
    rel_pos = 0.1 * jax.random.normal(ks[7], (B, NH, S, S), dtype=jnp.float32)
    rel_2d_pos = 0.1 * jax.random.normal(ks[8], (B, NH, S, S), dtype=jnp.float32)
    # Additive attention mask: mask out the last 2 keys of batch 1.
    attention_mask = jnp.zeros((B, 1, 1, S), dtype=jnp.float32)
    attention_mask = attention_mask.at[1, :, :, -2:].set(-10000.0)

    # Weight packing happens once (model init), not per forward.
    w_qkv, b_qkv = pack_qkv_params(q_w, q_b, k_w, k_b, v_w, v_b, NH)

    out = layoutlmv3_self_attention(
        hidden_states, w_qkv, b_qkv, NH,
        attention_mask=attention_mask, rel_pos=rel_pos, rel_2d_pos=rel_2d_pos)
    out = jax.block_until_ready(out)

    ref = _reference(
        hidden_states, q_w, q_b, k_w, k_b, v_w, v_b, NH,
        attention_mask=attention_mask, rel_pos=rel_pos, rel_2d_pos=rel_2d_pos)

    assert out.shape == (B, S, H), out.shape
    assert jnp.allclose(out, ref, atol=2e-3, rtol=2e-3), \
        f"mismatch vs reference, max err {jnp.max(jnp.abs(out - ref))}"

    print("KERNEL_OK")
</pallas_src>

<mosaic_0001>
module attributes {stable_mosaic.version = 11 : i64} {
  func.func @_qkv_proj_kernel(%arg0: i32, %arg1: memref<16x32xf32, #tpu.memory_space<vmem>>, %arg2: memref<32x96xf32, #tpu.memory_space<vmem>>, %arg3: memref<1x96xf32, #tpu.memory_space<vmem>>, %arg4: memref<16x32xf32, #tpu.memory_space<vmem>>, %arg5: memref<16x32xf32, #tpu.memory_space<vmem>>, %arg6: memref<16x32xf32, #tpu.memory_space<vmem>>) attributes {dimension_semantics = [#tpu.dimension_semantics<parallel>], iteration_bounds = array<i64: 1>, scalar_prefetch = 0 : i64, scratch_operands = 0 : i64, tpu.core_type = #tpu.core_type<tc>, window_params = [{transform_indices = @transform_0, window_bounds = array<i64: 16, 32>}, {pipeline_mode = #tpu.pipeline_mode<synchronous>, transform_indices = @transform_1, window_bounds = array<i64: 32, 96>}, {pipeline_mode = #tpu.pipeline_mode<synchronous>, transform_indices = @transform_2, window_bounds = array<i64: 1, 96>}, {transform_indices = @transform_3, window_bounds = array<i64: 16, 32>}, {transform_indices = @transform_4, window_bounds = array<i64: 16, 32>}, {transform_indices = @transform_5, window_bounds = array<i64: 16, 32>}]} {
    %c0 = arith.constant 0 : index
    %c0_0 = arith.constant 0 : index
    %0 = vector.load %arg1[%c0, %c0_0] : memref<16x32xf32, #tpu.memory_space<vmem>>, vector<16x32xf32>
    %c0_1 = arith.constant 0 : index
    %c0_2 = arith.constant 0 : index
    %1 = vector.load %arg2[%c0_1, %c0_2] : memref<32x96xf32, #tpu.memory_space<vmem>>, vector<32x96xf32>
    %cst = arith.constant dense<0.000000e+00> : vector<16x96xf32>
    %2 = tpu.matmul %0, %1, %cst {dimension_numbers = #tpu.dot_dimension_numbers<[1], [0], [0], [1], [0, 0, 1, 1], [], []>} : vector<16x32xf32>, vector<32x96xf32>, vector<16x96xf32> -> vector<16x96xf32>
    %c0_3 = arith.constant 0 : index
    %c0_4 = arith.constant 0 : index
    %3 = vector.load %arg3[%c0_3, %c0_4] : memref<1x96xf32, #tpu.memory_space<vmem>>, vector<1x96xf32>
    %4 = vector.broadcast %3 : vector<1x96xf32> to vector<16x96xf32>
    %5 = arith.addf %2, %4 : vector<16x96xf32>
    %6 = vector.extract_strided_slice %5 {offsets = [0, 0], sizes = [16, 32], strides = [1, 1]} : vector<16x96xf32> to vector<16x32xf32>
    %c0_5 = arith.constant 0 : index
    %c0_6 = arith.constant 0 : index
    %7 = vector.load %arg4[%c0_5, %c0_6] : memref<16x32xf32, #tpu.memory_space<vmem>>, vector<16x32xf32>
    tpu.vector_store %arg4[%c0_5, %c0_6], %6 {strides = array<i32>} : memref<16x32xf32, #tpu.memory_space<vmem>>, vector<16x32xf32>,
    %8 = vector.extract_strided_slice %5 {offsets = [0, 32], sizes = [16, 32], strides = [1, 1]} : vector<16x96xf32> to vector<16x32xf32>
    %c0_7 = arith.constant 0 : index
    %c0_8 = arith.constant 0 : index
    %9 = vector.load %arg5[%c0_7, %c0_8] : memref<16x32xf32, #tpu.memory_space<vmem>>, vector<16x32xf32>
    tpu.vector_store %arg5[%c0_7, %c0_8], %8 {strides = array<i32>} : memref<16x32xf32, #tpu.memory_space<vmem>>, vector<16x32xf32>,
    %10 = vector.extract_strided_slice %5 {offsets = [0, 64], sizes = [16, 32], strides = [1, 1]} : vector<16x96xf32> to vector<16x32xf32>
    %c0_9 = arith.constant 0 : index
    %c0_10 = arith.constant 0 : index
    %11 = vector.load %arg6[%c0_9, %c0_10] : memref<16x32xf32, #tpu.memory_space<vmem>>, vector<16x32xf32>
    tpu.vector_store %arg6[%c0_9, %c0_10], %10 {strides = array<i32>} : memref<16x32xf32, #tpu.memory_space<vmem>>, vector<16x32xf32>,
    return
  }
  func.func @transform_0(%arg0: i32) -> (i32, i32) {
    %c0_i32 = arith.constant 0 : i32
    %c0_i32_0 = arith.constant 0 : i32
    return %arg0, %c0_i32 : i32, i32
  }
  func.func @transform_1(%arg0: i32) -> (i32, i32) {
    %c0_i32 = arith.constant 0 : i32
    %c0_i32_0 = arith.constant 0 : i32
    %c0_i32_1 = arith.constant 0 : i32
    return %c0_i32, %c0_i32_0 : i32, i32
  }
  func.func @transform_2(%arg0: i32) -> (i32, i32) {
    %c0_i32 = arith.constant 0 : i32
    %c0_i32_0 = arith.constant 0 : i32
    %c0_i32_1 = arith.constant 0 : i32
    return %c0_i32, %c0_i32_0 : i32, i32
  }
  func.func @transform_3(%arg0: i32) -> (i32, i32) {
    %c0_i32 = arith.constant 0 : i32
    %c0_i32_0 = arith.constant 0 : i32
    return %arg0, %c0_i32 : i32, i32
  }
  func.func @transform_4(%arg0: i32) -> (i32, i32) {
    %c0_i32 = arith.constant 0 : i32
    %c0_i32_0 = arith.constant 0 : i32
    return %arg0, %c0_i32 : i32, i32
  }
  func.func @transform_5(%arg0: i32) -> (i32, i32) {
    %c0_i32 = arith.constant 0 : i32
    %c0_i32_0 = arith.constant 0 : i32
    return %arg0, %c0_i32 : i32, i32
  }
}

</mosaic_0001>

<bundles_post_ra>
// kernel: tpu_custom_call.1
= control target key start
LH: loop header
LB: loop body
LE: loop exit
PB: predicated region body
PF: predicated region fallthrough
CT: control target
= control target key end

     0   :  { %11 = vsyncpa [#allocation3], 0  ;;  %s498_s0 = inlined_call_operand.hbm [shape: f32[16,32], index: 0, kind: input, shape index: {}]   ;;  %s499_s1 = inlined_call_operand.hbm [shape: f32[32,96], index: 1, kind: input, shape index: {}]   ;;  %s500_s2 = inlined_call_operand.vmem [shape: f32[1,96], index: 2, kind: input, shape index: {}]   ;;  %s501_s3 = inlined_call_operand.hbm [shape: f32[16,32], index: 3, kind: output, shape index: {0}]   ;;  %s502_s4 = inlined_call_operand.hbm [shape: f32[16,32], index: 4, kind: output, shape index: {1}]   ;;  %s503_s5 = inlined_call_operand.hbm [shape: f32[16,32], index: 5, kind: output, shape index: {2}]  }
   0x1   :  { %12 = vsyncpa [#allocation6], 0 }
   0x2   :  { %13 = vsyncpa [#allocation4], 0 }
   0x3   :  { %14 = vsyncpa [#allocation9], 0  ;;  %s366_s18 = smov [#allocation2]   ;;  %s248_s22 = scalar_lea.hbm %s498_s0, 256 }
   0x4   :  { %s20_s19 = sshll.u32 %s366_s18, 4  ;;  %p249_p0 = scmp.ne.s32.totalorder %s498_s0, %s248_s22  ;;  %s21_s19 = int_to_ptr.vmem [resolvable:$true] %s20_s19 }
   0x5   :  { %p252_p1 = scmp.lt.u32.totalorder %s248_s22, %s498_s0 }
   0x7   :  { %p254_p2 = pnand %p252_p1, %p249_p0 }
   0x9   :  { %257 = shalt.err (!%p254_p2)
}
   0xa   :  { %s258_s27 = scalar_lea.vmem %s21_s19, 256  ;;  %p263_p4 = scmp.lt.s32.totalorder %s21_s19, %s21_s19 }
   0xb   :  { %p259_p3 = scmp.ne.s32.totalorder %s21_s19, %s258_s27  ;;  %p264_p5 = scmp.lt.s32.totalorder %s258_s27, %s258_s27 }
   0xd   :  { %p265_p6 = por %p264_p5, %p263_p4 }
   0xf   :  { %p266_p7 = pnand %p265_p6, %p259_p3 }
  0x11   :  { %269 = shalt.err (!%p266_p7)
}
  0x12   :  { %s367_s28 = smov 128   ;;  %s368_s29 = smov 8  }
  0x13   :  { %26 = dma.hbm_to_vmem [thread:$0]  %s498_s0, 256, %s21_s19, [#allocation3], %s367_s28, %s367_s28, %s368_s29  }
  0x14   :  { %s369_s7 = smov [#allocation5]   ;;  %s270_s11 = scalar_lea.hbm %s499_s1, 512 }
  0x15   :  { %s32_s8 = sshll.u32 %s369_s7, 4  ;;  %p271_p8 = scmp.ne.s32.totalorder %s499_s1, %s270_s11  ;;  %s33_s8 = int_to_ptr.vmem [resolvable:$true] %s32_s8 }
  0x16   :  { %p274_p9 = scmp.lt.u32.totalorder %s270_s11, %s499_s1 }
  0x18   :  { %p276_p10 = pnand %p274_p9, %p271_p8 }
  0x1a   :  { %279 = shalt.err (!%p276_p10)
}
  0x1b   :  { %s280_s16 = scalar_lea.vmem %s33_s8, 512  ;;  %p285_p12 = scmp.lt.s32.totalorder %s33_s8, %s33_s8 }
  0x1c   :  { %p281_p11 = scmp.ne.s32.totalorder %s33_s8, %s280_s16  ;;  %p286_p13 = scmp.lt.s32.totalorder %s280_s16, %s280_s16 }
  0x1e   :  { %p287_p0 = por %p286_p13, %p285_p12 }
  0x20   :  { %p288_p1 = pnand %p287_p0, %p281_p11 }
  0x22   :  { %291 = shalt.err (!%p288_p1)
}
  0x23   :  { %38 = dma.hbm_to_vmem [thread:$0]  %s499_s1, 512, %s33_s8, [#allocation6], %s367_s28, %s367_s28, %s368_s29  }
  0x24   :  { %358 = dma.done.wait [#allocation3], 256  }
  0x25   :  { %359 = vsyncadd [#allocation3], 4294967040 }
  0x26   :  { %360 = dma.done.wait [#allocation6], 512  }
  0x27   :  { %361 = vsyncadd [#allocation6], 4294966784  ;;  %vm60_vm0 = vcmask 261120   ;;  %v49_v0 = vld [vmem:[#allocation5] sm:$0xff]  ;;  %v50_v1 = vld [vmem:[#allocation5 + $0x8] sm:$0xff]  ;;  %s370_s19 = smov [#allocation7]  }
  0x28   :  { %v51_v2 = vld [vmem:[#allocation5 + $0x10] sm:$0xff]  ;;  %v231_v3 = vpack.c.bf16 %v50_v1, %v49_v0  ;;  %v52_v4 = vld [vmem:[#allocation5 + $0x18] sm:$0xff]  ;;  %s167_s20 = sshll.u32 %s370_s19, 4  ;;  %s371_s21 = smov 64   ;;  %s168_s20 = int_to_ptr.vmem [resolvable:$true] %s167_s20 }
  0x29   :  { %v47_v5 = vld [vmem:[#allocation2] sm:$0xff]  ;;  %v235_v6 = vpack.c.bf16 %v52_v4, %v51_v2  ;;  %v48_v7 = vld [vmem:[#allocation2 + $0x8] sm:$0xff]  ;;  %s372_s22 = smov 96   ;;  %s292_s23 = scalar_lea.vmem %s168_s20, 256 }
  0x2a   :  { %228 = vmatprep.mubr.msk.f32.mxu0 %vm60_vm0, %v47_v5  ;;  %232 = vmatprep.subr.bf16.mxu0 %v231_v3  ;;  %v211_v8 = vld [vmem:[%s500_s2] ss:$0 sm:$0xff]  ;;  %p293_p2 = scmp.ne.s32.totalorder %s168_s20, %s292_s23  ;;  %p297_p3 = scmp.lt.s32.totalorder %s168_s20, %s168_s20 }
  0x2b   :  { %234 = vmatpush3.bf16.msra.mxu0 %v231_v3  ;;  %p298_p4 = scmp.lt.s32.totalorder %s292_s23, %s292_s23 }
  0x2c   :  { %236 = vmatprep.subr.bf16.mxu0 %v235_v6 }
  0x2d   :  { %p299_p5 = por %p298_p4, %p297_p3 }
  0x2f   :  { %238 = vmatpush3.bf16.msra.mxu0 %v235_v6  ;;  %p300_p6 = pnand %p299_p5, %p293_p2 }
  0x32   :  { %229 = vmatmul.mubr.msk.f32.vlgmr.msra.gmra.mrb[0].mxu0 %vm60_vm0, %v48_v7 }
 0x105   :  { %v230_v9 = vpop.f32.mrb[0].mxu0 }
 0x106   :  { %v139_v10 = vadd.f32 %v230_v9, %v211_v8  ;;  %v133_v11 = vpop.f32.mrb[1].mxu0 }
 0x107   :  { %v134_v12 = vadd.f32 %v211_v8, %v133_v11 }
 0x108   :  { %143 = vst.msk [vmem:[#allocation7 + $0x8] sm:$0xff] %vm60_vm0, %v139_v10 }
 0x109   :  { %142 = vst.msk [vmem:[#allocation7] sm:$0xff] %vm60_vm0, %v134_v12  ;;  %154 = vrot.lane.b32.xlu1 %v134_v12, %s371_s21  ;;  %146 = vrot.lane.b32.xlu0 %v134_v12, %s372_s22 }
 0x10a   :  { %303 = shalt.err (!%p300_p6)
}
 0x10b   :  { %s304_s25 = scalar_lea.hbm %s501_s3, 256 }
 0x10c   :  { %p305_p7 = scmp.ne.s32.totalorder %s501_s3, %s304_s25  ;;  %p308_p8 = scmp.lt.u32.totalorder %s304_s25, %s501_s3 }
 0x10e   :  { %p310_p9 = pnand %p308_p8, %p305_p7 }
 0x110   :  { %313 = shalt.err (!%p310_p9)
}
 0x111   :  { %173 = dma.vmem_to_hbm [thread:$0]  %s168_s20, 256, %s501_s3, [#allocation4], %s367_s28, %s367_s28, %s368_s29  }
 0x112   :  { %156 = vrot.lane.b32.xlu1 %v139_v10, %s371_s21  ;;  %148 = vrot.lane.b32.xlu0 %v139_v10, %s372_s22  ;;  %s373_s9 = smov [#allocation8]   ;;  %s374_s11 = smov [#allocation10]  }
 0x113   :  { %s179_s10 = sshll.u32 %s373_s9, 4  ;;  %s191_s12 = sshll.u32 %s374_s11, 4  ;;  %s180_s10 = int_to_ptr.vmem [resolvable:$true] %s179_s10  ;;  %s459_s12 = int_to_ptr.vmem [resolvable:$true] %s191_s12 }
 0x114   :  { %s314_s3 = scalar_lea.vmem %s180_s10, 256  ;;  %p319_p11 = scmp.lt.s32.totalorder %s180_s10, %s180_s10 }
 0x115   :  { %p315_p10 = scmp.ne.s32.totalorder %s180_s10, %s314_s3  ;;  %p320_p12 = scmp.lt.s32.totalorder %s314_s3, %s314_s3 }
 0x117   :  { %p321_p13 = por %p320_p12, %p319_p11 }
 0x119   :  { %p322_p0 = pnand %p321_p13, %p315_p10 }
 0x17b   :  { %v155_v13 = vpop.permute.xlu1 %154  ;;  %v147_v14 = vpop.permute.xlu0 %146 }
 0x17c   :  { %160 = vst.msk [vmem:[#allocation10] sm:$0xff] %vm60_vm0, %v155_v13  ;;  %152 = vst.msk [vmem:[#allocation8] sm:$0xff] %vm60_vm0, %v147_v14 }
 0x184   :  { %v157_v15 = vpop.permute.xlu1 %156  ;;  %v149_v16 = vpop.permute.xlu0 %148 }
 0x185   :  { %161 = vst.msk [vmem:[#allocation10 + $0x8] sm:$0xff] %vm60_vm0, %v157_v15  ;;  %153 = vst.msk [vmem:[#allocation8 + $0x8] sm:$0xff] %vm60_vm0, %v149_v16 }
 0x186   :  { %325 = shalt.err (!%p322_p0)
}
 0x187   :  { %s326_s15 = scalar_lea.hbm %s502_s4, 256 }
 0x188   :  { %p327_p1 = scmp.ne.s32.totalorder %s502_s4, %s326_s15  ;;  %p330_p2 = scmp.lt.u32.totalorder %s326_s15, %s502_s4 }
 0x18a   :  { %p332_p3 = pnand %p330_p2, %p327_p1 }
 0x18c   :  { %335 = shalt.err (!%p332_p3)
}
 0x18d   :  { %185 = dma.vmem_to_hbm [thread:$0]  %s180_s10, 256, %s502_s4, [#allocation9], %s367_s28, %s367_s28, %s368_s29  }
 0x18e   :  { %s336_s20 = scalar_lea.vmem %s459_s12, 256  ;;  %p341_p5 = scmp.lt.s32.totalorder %s459_s12, %s459_s12 }
 0x18f   :  { %p337_p4 = scmp.ne.s32.totalorder %s459_s12, %s336_s20  ;;  %p342_p6 = scmp.lt.s32.totalorder %s336_s20, %s336_s20 }
 0x191   :  { %p343_p7 = por %p342_p6, %p341_p5 }
 0x193   :  { %p344_p8 = pnand %p343_p7, %p337_p4 }
 0x195   :  { %347 = shalt.err (!%p344_p8)
}
 0x196   :  { %s348_s23 = scalar_lea.hbm %s503_s5, 256 }
 0x197   :  { %p349_p9 = scmp.ne.s32.totalorder %s503_s5, %s348_s23  ;;  %p352_p10 = scmp.lt.u32.totalorder %s348_s23, %s503_s5 }
 0x199   :  { %p354_p11 = pnand %p352_p10, %p349_p9 }
 0x19b   :  { %357 = shalt.err (!%p354_p11)
}
 0x19c   :  { %197 = dma.vmem_to_hbm [thread:$0]  %s459_s12, 256, %s503_s5, [#allocation9], %s367_s28, %s367_s28, %s368_s29  }
 0x19d   :  { %362 = dma.done.wait [#allocation4], 256  }
 0x19e   :  { %363 = vsyncadd [#allocation4], 4294967040 }
 0x19f   :  { %364 = dma.done.wait [#allocation9], 512  }
 0x1a0   :  { %365 = vsyncadd [#allocation9], 4294966784 }
 0x1a1   :  { %207 = vsyncpa [#allocation3], 1 }
 0x1a2   :  { %208 = vsyncpa [#allocation6], 1 }
 0x1a3   :  { %209 = vsyncpa [#allocation4], 1 }
 0x1a4   :  { %210 = vsyncpa [#allocation9], 1 }

</bundles_post_ra>
